<compile_context>
chip_gen: v5e
topology: v5e:2x2
jax: 0.10.0
libtpu: 0.0.40
codegen_flags: <defaults>
</compile_context>

<pallas_src>
import jax
import jax.numpy as jnp
from jax.experimental import pallas as pl
from jax.experimental.pallas import tpu as pltpu


def _fw_kernel(it_ref, wl_ref, new_w_ref, wloss_ref):
    # gamma = 2 / (iteration + 2), from the int32 SMEM scalar.
    gamma = jnp.float32(2.0) / (it_ref[0].astype(jnp.float32) + jnp.float32(2.0))
    one_minus_gamma = jnp.float32(1.0) - gamma

    w = wl_ref[0:1, :]  # (1, T) f32  -- current weights
    l = wl_ref[1:2, :]  # (1, T) f32  -- stacked per-task losses

    # --- scalar path: weighted loss --------------------------------------
    # sum(new_w * l) == (1-gamma)*sum(w*l) + gamma*sum(s*l) == (1-gamma)*sum(w*l) + gamma*min(l)
    # (exact up to FP reassociation).  This path does NOT depend on the argmin/one-hot below.
    min_val = jnp.min(l, axis=1, keepdims=True)                 # (1, 1)
    wl_dot = jnp.sum(w * l)                                     # scalar
    wloss_ref[0] = one_minus_gamma * wl_dot + gamma * min_val[0, 0]

    # --- vector path: Frank-Wolfe weight update ---------------------------
    # argmin with first-occurrence tie-break (matches torch.argmin for non-NaN inputs).
    # NOTE: NaN losses diverge from torch (here s collapses to all-zeros); acceptable since
    # NaN losses are already a broken training state.
    lane = jax.lax.broadcasted_iota(jnp.int32, l.shape, 1)      # (1, T)
    cand = jnp.where(l == min_val, lane, jnp.int32(2 ** 30))
    min_idx = jnp.min(cand, axis=1, keepdims=True)              # (1, 1)
    s = jnp.where(lane == min_idx, jnp.float32(1.0), jnp.float32(0.0))

    new_w_ref[...] = one_minus_gamma * w + gamma * s


def frank_wolfe_loss(weights, losses, iteration, total_iterations=None):
    """Functional equivalent of FrankWolfeLoss.forward.

    Returns (weighted_loss, new_weights); the caller carries new_weights forward
    (the nn.Parameter in-place copy_ has no JAX analogue).
    """
    del total_iterations  # unused by the reference forward as well
    num_tasks = weights.shape[-1]

    it = jnp.reshape(jnp.asarray(iteration, jnp.int32), (1,))
    # Pack weights (row 0) and losses (row 1) into one (2, T) buffer -> single input DMA.
    wl = jnp.stack(
        [
            jnp.reshape(weights.astype(jnp.float32), (num_tasks,)),
            jnp.reshape(losses.astype(jnp.float32), (num_tasks,)),
        ],
        axis=0,
    )

    new_w, wloss = pl.pallas_call(
        _fw_kernel,
        out_shape=(
            jax.ShapeDtypeStruct((1, num_tasks), jnp.float32),  # new_weights
            jax.ShapeDtypeStruct((1,), jnp.float32),            # weighted loss (SMEM scalar)
        ),
        in_specs=[
            pl.BlockSpec(memory_space=pltpu.MemorySpace.SMEM),  # iteration (int32 scalar)
            pl.BlockSpec(memory_space=pltpu.MemorySpace.VMEM),  # packed [weights; losses]
        ],
        out_specs=(
            pl.BlockSpec(memory_space=pltpu.MemorySpace.VMEM),
            pl.BlockSpec(memory_space=pltpu.MemorySpace.SMEM),
        ),
    )(it, wl)

    return wloss[0], new_w[0]


def _reference(weights, losses, iteration):
    # pure-JAX reference mirroring the PyTorch module
    gamma = 2.0 / (jnp.float32(iteration) + 2.0)
    s = jax.nn.one_hot(jnp.argmin(losses), losses.shape[0], dtype=jnp.float32)
    new_w = (1.0 - gamma) * weights + gamma * s
    return jnp.sum(new_w * losses), new_w


if __name__ == "__main__":
    fw = jax.jit(frank_wolfe_loss)

    # --- test 1: num_tasks=2, deterministic init weights = ones/num_tasks -------------
    num_tasks = 2
    weights = jnp.ones((num_tasks,), jnp.float32) / num_tasks
    key = jax.random.PRNGKey(0)
    losses = jax.random.uniform(key, (num_tasks,), jnp.float32) * 2.0
    iteration = jnp.int32(3)

    wloss, new_w = fw(weights, losses, iteration, 10)
    wloss = jax.block_until_ready(wloss)
    new_w = jax.block_until_ready(new_w)

    ref_loss, ref_w = _reference(weights, losses, iteration)
    assert jnp.allclose(wloss, ref_loss, atol=1e-6), (wloss, ref_loss)
    assert jnp.allclose(new_w, ref_w, atol=1e-6), (new_w, ref_w)

    # --- test 2: larger task count with a tie (first-occurrence argmin must win) ------
    num_tasks2 = 8
    weights2 = jnp.ones((num_tasks2,), jnp.float32) / num_tasks2
    losses2 = jax.random.uniform(jax.random.PRNGKey(1), (num_tasks2,), jnp.float32) + 0.5
    losses2 = losses2.at[2].set(0.25).at[5].set(0.25)  # tie: index 2 must be chosen
    iteration2 = jnp.int32(0)

    wloss2, new_w2 = fw(weights2, losses2, iteration2, 10)
    wloss2 = jax.block_until_ready(wloss2)
    new_w2 = jax.block_until_ready(new_w2)

    ref_loss2, ref_w2 = _reference(weights2, losses2, iteration2)
    assert jnp.allclose(wloss2, ref_loss2, atol=1e-6), (wloss2, ref_loss2)
    assert jnp.allclose(new_w2, ref_w2, atol=1e-6), (new_w2, ref_w2)

    print("KERNEL_OK")
</pallas_src>

<mosaic_0001>
module attributes {stable_mosaic.version = 11 : i64} {
  func.func @_fw_kernel(%arg0: memref<1xi32, #tpu.memory_space<smem>>, %arg1: memref<2x2xf32, #tpu.memory_space<vmem>>, %arg2: memref<1x2xf32, #tpu.memory_space<vmem>>, %arg3: memref<1xf32, #tpu.memory_space<smem>>) attributes {dimension_semantics = [], scalar_prefetch = 0 : i64, scratch_operands = 0 : i64, tpu.core_type = #tpu.core_type<tc>} {
    %c0 = arith.constant 0 : index
    %0 = memref.load %arg0[%c0] : memref<1xi32, #tpu.memory_space<smem>>
    %1 = arith.sitofp %0 : i32 to f32
    %cst = arith.constant 2.000000e+00 : f32
    %2 = arith.addf %1, %cst : f32
    %cst_0 = arith.constant 2.000000e+00 : f32
    %3 = arith.divf %cst_0, %2 : f32
    %cst_1 = arith.constant 1.000000e+00 : f32
    %4 = arith.subf %cst_1, %3 : f32
    %c0_2 = arith.constant 0 : index
    %c0_3 = arith.constant 0 : index
    %5 = vector.load %arg1[%c0_2, %c0_3] : memref<2x2xf32, #tpu.memory_space<vmem>>, vector<1x2xf32>
    %c1 = arith.constant 1 : index
    %c0_4 = arith.constant 0 : index
    %6 = vector.load %arg1[%c1, %c0_4] : memref<2x2xf32, #tpu.memory_space<vmem>>, vector<1x2xf32>
    %cst_5 = arith.constant dense<0x7F800000> : vector<1xf32>
    %7 = vector.multi_reduction <minimumf>, %6, %cst_5 [1] : vector<1x2xf32> to vector<1xf32>
    %8 = vector.shape_cast %7 : vector<1xf32> to vector<1x1xf32>
    %9 = arith.mulf %5, %6 : vector<1x2xf32>
    %10 = vector.shape_cast %9 : vector<1x2xf32> to vector<1x1x2xf32>
    %cst_6 = arith.constant dense<0.000000e+00> : vector<1xf32>
    %11 = vector.multi_reduction <add>, %10, %cst_6 [1, 2] : vector<1x1x2xf32> to vector<1xf32>
    %12 = vector.shape_cast %11 : vector<1xf32> to vector<1x1x1xf32>
    %13 = vector.extract %12[0, 0, 0] : f32 from vector<1x1x1xf32>
    %14 = arith.mulf %4, %13 : f32
    %15 = vector.extract %8[0, 0] : f32 from vector<1x1xf32>
    %16 = arith.mulf %3, %15 : f32
    %17 = arith.addf %14, %16 : f32
    %c0_7 = arith.constant 0 : index
    %18 = memref.load %arg3[%c0_7] : memref<1xf32, #tpu.memory_space<smem>>
    memref.store %17, %arg3[%c0_7] : memref<1xf32, #tpu.memory_space<smem>>
    %19 = tpu.iota {dimensions = array<i32: 1>} : vector<1x2xi32>
    %20 = vector.broadcast %8 : vector<1x1xf32> to vector<1x2xf32>
    %21 = arith.cmpf oeq, %6, %20 : vector<1x2xf32>
    %c1073741824_i32 = arith.constant 1073741824 : i32
    %22 = vector.broadcast %c1073741824_i32 : i32 to vector<1x2xi32>
    %23 = arith.select %21, %19, %22 : vector<1x2xi1>, vector<1x2xi32>
    %cst_8 = arith.constant dense<2147483647> : vector<1xi32>
    %24 = vector.multi_reduction <minsi>, %23, %cst_8 [1] : vector<1x2xi32> to vector<1xi32>
    %25 = vector.shape_cast %24 : vector<1xi32> to vector<1x1xi32>
    %26 = vector.broadcast %25 : vector<1x1xi32> to vector<1x2xi32>
    %27 = arith.cmpi eq, %19, %26 : vector<1x2xi32>
    %cst_9 = arith.constant 1.000000e+00 : f32
    %cst_10 = arith.constant 0.000000e+00 : f32
    %28 = vector.broadcast %cst_9 : f32 to vector<1x2xf32>
    %29 = vector.broadcast %cst_10 : f32 to vector<1x2xf32>
    %30 = arith.select %27, %28, %29 : vector<1x2xi1>, vector<1x2xf32>
    %31 = vector.broadcast %4 : f32 to vector<1x2xf32>
    %32 = arith.mulf %31, %5 : vector<1x2xf32>
    %33 = vector.broadcast %3 : f32 to vector<1x2xf32>
    %34 = arith.mulf %33, %30 : vector<1x2xf32>
    %35 = arith.addf %32, %34 : vector<1x2xf32>
    %c0_11 = arith.constant 0 : index
    %c0_12 = arith.constant 0 : index
    %36 = vector.load %arg2[%c0_11, %c0_12] : memref<1x2xf32, #tpu.memory_space<vmem>>, vector<1x2xf32>
    tpu.vector_store %arg2[%c0_11, %c0_12], %35 {strides = array<i32>} : memref<1x2xf32, #tpu.memory_space<vmem>>, vector<1x2xf32>,
    return
  }
}

</mosaic_0001>

<bundles_post_ra>
// kernel: frank_wolfe_loss.1
= control target key start
LH: loop header
LB: loop body
LE: loop exit
PB: predicated region body
PF: predicated region fallthrough
CT: control target
= control target key end

     0   :  { %10 = vsyncpa [#allocation4], 0  ;;  %vm39_vm0 = vcmask 8192   ;;  %s220_s0 = inlined_call_operand.<no memory space> [shape: s32[1], index: 0, kind: input, shape index: {}]   ;;  %s221_s1 = inlined_call_operand.vmem [shape: f32[2,2], index: 1, kind: input, shape index: {}]   ;;  %s222_s2 = inlined_call_operand.hbm [shape: f32[1,2], index: 2, kind: output, shape index: {0}]   ;;  %s223_s3 = inlined_call_operand.hbm [shape: f32[1], index: 3, kind: output, shape index: {1}]  }
   0x1   :  { %v38_v0 = vld [vmem:[%s221_s1 + $0x1] sm:$0x1]  ;;  %v198_v1 = vld [vmem:[%s221_s1] sm:$0x1] }
   0x2   :  { %v40_v2 = vsel %vm39_vm0, %v38_v0, inf }
   0x3   :  { %11 = vsyncpa [#allocation5], 0  ;;  %41 = vmin.xlane.f32.xlu0 %v40_v2  ;;  %v43_v3 = vmul.f32 %v38_v0, %v198_v1  ;;  %s17_s18 = scvt.s32.f32 %s220_s0  ;;  %v60_v16 = vlaneseq  ;;  %s103_s28 = sshll.u32 %s223_s3, 4  ;;  %v170_v42 = vmov 0.0   ;;  %s104_s28 = int_to_ptr.hbm [resolvable:$true] %s103_s28 }
   0x4   :  { %s169_s29 = smov [#allocation6]   ;;  %s171_s30 = smov [#allocation3]  }
   0x5   :  { %v44_v4 = vsel %vm39_vm0, %v43_v3, 0.0  ;;  %s18_s19 = sadd.f32 2.0, %s17_s18  ;;  %v61_v17 = vand.u32 127, %v60_v16  ;;  %s92_s4 = sshll.u32 %s171_s30, 4  ;;  %s93_s4 = int_to_ptr.vmem [resolvable:$true] %s92_s4 }
   0x6   :  { %s94_s3 = sshll.u32 %s222_s2, 4  ;;  %s95_s3 = int_to_ptr.hbm [resolvable:$true] %s94_s3 }
   0x7   :  { %v19_v5 = vstv %s18_s19 }
   0x8   :  { %127 = vrcp.f32 %v19_v5  ;;  %v31_v10 = vand.u32 2147483648, %v19_v5  ;;  %vm25_vm1 = vweird.f32 %v19_v5  ;;  %v29_v12 = vand.u32 2147483647, %v19_v5 }
   0xa   :  { %v32_v13 = vor.u32 1.1754944e-38, %v31_v10  ;;  %vm30_vm4 = vcmp.eq.f32.partialorder %v29_v12, 8.507059e+37 }
   0xb   :  { %45 = vadd.xlane.f32.xlu0 %v44_v4 }
   0xe   :  { %v128_v6 = vpop.eup %127 }
   0xf   :  { %v21_v7 = vmul.f32 %v128_v6, %v19_v5  ;;  %vm26_vm2 = vweird.f32 %v128_v6 }
  0x10   :  { %vm27_vm3 = vmor %vm25_vm1, %vm26_vm2 }
  0x11   :  { %v22_v8 = vsub.f32 1.0, %v21_v7 }
  0x13   :  { %v23_v9 = vmul.f32 %v128_v6, %v22_v8 }
  0x15   :  { %v24_v11 = vadd.f32 %v128_v6, %v23_v9 }
  0x17   :  { %v28_v14 = vsel %vm27_vm3, %v128_v6, %v24_v11 }
  0x18   :  { %v33_v15 = vsel %vm30_vm4, %v32_v13, %v28_v14 }
  0x19   :  { %118 = vpush %v33_v15 }
  0x4a   :  { %s119_s0 = spop %118 }
  0x4b   :  { %s207_s1 = smul.f32 2.0, %s119_s0 }
  0x4d   :  { %s36_s20 = ssub.f32 1.0, %s207_s1  ;;  %v83_v41 = vstv %s207_s1 }
  0x4f   :  { %v81_v38 = vstv %s36_s20 }
  0x50   :  { %v82_v40 = vmul.f32 %v81_v38, %v198_v1 }
  0x76   :  { %v42_v18 = vpop.xlane.xlu0 %41 }
  0x77   :  { %vm62_vm5 = vcmp.eq.f32.partialorder %v38_v0, %v42_v18 }
  0x78   :  { %v63_v19 = vsel %vm62_vm5, %v61_v17, 1073741824 }
  0x79   :  { %v64_v20 = vsel %vm39_vm0, %v63_v19, 2147483647 }
  0x7a   :  { %v66_v21 = vshra.s32 %v64_v20, 16  ;;  %v65_v30 = vand.u32 65535, %v64_v20 }
  0x7c   :  { %v68_v22 = vcvt.s32.f32 %v66_v21  ;;  %v67_v32 = vcvt.s32.f32 %v65_v30 }
  0x7e   :  { %69 = vmin.xlane.f32.xlu1 %v68_v22  ;;  %v46_v23 = vpop.xlane.xlu0 %45 }
  0x7f   :  { %v47_v24 = vrot.slane %v46_v23, 4 }
  0x81   :  { %v48_v25 = vadd.f32 %v47_v24, %v46_v23 }
  0x83   :  { %v49_v26 = vrot.slane %v48_v25, 2 }
  0x85   :  { %v50_v27 = vadd.f32 %v49_v26, %v48_v25 }
  0x87   :  { %v51_v28 = vrot.slane %v50_v27, 1 }
  0x89   :  { %v52_v29 = vadd.f32 %v51_v28, %v50_v27 }
  0x8b   :  { %120 = vpush %v52_v29 }
  0x8c   :  { %122 = vpush %v42_v18 }
  0xbc   :  { %s121_s21 = spop %120 }
  0xbd   :  { %s54_s22 = smul.f32 %s121_s21, %s36_s20  ;;  %s123_s23 = spop %122 }
  0xbe   :  { %s56_s24 = smul.f32 %s123_s23, %s207_s1 }
  0xc0   :  { %s57_s25 = sadd.f32 %s56_s24, %s54_s22 }
  0xc2   :  { %59 = sst [smem:[#allocation6]] %s57_s25 }
  0xc3   :  { %106 = dma.smem_to_hbm %s169_s29, 16, %s104_s28, [#allocation5]  }
  0xf1   :  { %v70_v31 = vpop.xlane.xlu1 %69 }
  0xf2   :  { %vm71_vm6 = vcmp.eq.f32.partialorder %v68_v22, %v70_v31  ;;  %v76_v34 = vcvt.f32.s32 %v70_v31 }
  0xf3   :  { %v72_v33 = vsel %vm71_vm6, %v67_v32, inf }
  0xf4   :  { %73 = vmin.xlane.f32.xlu1 %v72_v33  ;;  %v77_v36 = vshll.u32 %v76_v34, 16 }
 0x167   :  { %v74_v35 = vpop.xlane.xlu1 %73 }
 0x168   :  { %v75_v37 = vcvt.f32.s32 %v74_v35 }
 0x16a   :  { %v78_v39 = vadd.s32 %v77_v36, %v75_v37 }
 0x16c   :  { %vm79_vm7 = vcmp.eq.s32.totalorder %v61_v17, %v78_v39 }
 0x16d   :  { %v80_v43 = vsel %vm79_vm7, 1.0, %v170_v42 }
 0x16e   :  { %v84_v44 = vmul.f32 %v83_v41, %v80_v43 }
 0x170   :  { %v85_v45 = vadd.f32 %v84_v44, %v82_v40 }
 0x172   :  { %86 = vst.msk [vmem:[#allocation3] sm:$0x1] %vm39_vm0, %v85_v45 }
 0x173   :  { %97 = dma.vmem_to_hbm [thread:$0]  %s93_s4, 16, %s95_s3, [#allocation4]  }
 0x174   :  { %165 = dma.done.wait [#allocation4], 16  }
 0x175   :  { %166 = vsyncadd [#allocation4], 4294967280 }
 0x176   :  { %167 = dma.done.wait [#allocation5], 16  }
 0x177   :  { %168 = vsyncadd [#allocation5], 4294967280 }
 0x178   :  { %115 = sfence }
 0x179   :  { %116 = vsyncpa [#allocation4], 1 }
 0x17a   :  { %117 = vsyncpa [#allocation5], 1 }

</bundles_post_ra>
